<compile_context>
chip_gen: v5e
topology: v5e:2x2
jax: 0.10.0
libtpu: 0.0.40
codegen_flags: <defaults>
</compile_context>

<pallas_src>
import jax
import jax.numpy as jnp
from jax.experimental import pallas as pl
from jax.experimental.pallas import tpu as pltpu


def _vmem_limit_bytes():
    """Scoped-VMEM request with headroom (v7x has only 64 MiB physical per TC)."""
    try:
        info = pltpu.get_tpu_info()
        cap = getattr(info, "vmem_capacity_bytes", 64 * 1024 * 1024)
    except Exception:
        cap = 64 * 1024 * 1024
    return int(min(cap * 3 // 4, 96 * 1024 * 1024))


# ---------------------------------------------------------------------------
# Phase 1: time-parallel fused input projection   G = BN(x) @ W_ih^T + (b_ih + b_hh)
# (BatchNorm already folded into the weights/bias by the wrapper; x pre-cast.)
# ---------------------------------------------------------------------------
def _input_proj_kernel(x_ref, w_ref, b_ref, g_ref):
    g_ref[...] = (jnp.dot(x_ref[...], w_ref[...], preferred_element_type=jnp.float32)
                  + b_ref[...]).astype(g_ref.dtype)          # (TILE_R, 4Hp)


def _input_projection(x2, w_in, b_in, *, tile_rows, out_dtype, vmem_limit):
    """x2: (R, D) matmul_dtype; w_in: (D, 4Hp) matmul_dtype; b_in: (1, 4Hp) f32."""
    R, D = x2.shape
    H4 = w_in.shape[1]
    tile_r = max(8, (min(tile_rows, R) // 8) * 8)
    R_pad = pl.cdiv(R, tile_r) * tile_r
    if R_pad != R:
        x2 = jnp.pad(x2, ((0, R_pad - R), (0, 0)))

    gin = pl.pallas_call(
        _input_proj_kernel,
        out_shape=jax.ShapeDtypeStruct((R_pad, H4), out_dtype),
        grid=(R_pad // tile_r,),
        in_specs=[
            pl.BlockSpec((tile_r, D), lambda r: (r, 0)),
            pl.BlockSpec((D, H4), lambda r: (0, 0), pipeline_mode=pl.Buffered(1)),
            pl.BlockSpec((1, H4), lambda r: (0, 0), pipeline_mode=pl.Buffered(1)),
        ],
        out_specs=pl.BlockSpec((tile_r, H4), lambda r: (r, 0)),
        compiler_params=pltpu.CompilerParams(
            dimension_semantics=("parallel",),               # shards across cores
            vmem_limit_bytes=vmem_limit),
    )(x2, w_in, b_in)
    return gin[:R]


# ---------------------------------------------------------------------------
# Phase 2: serial LSTM recurrence, TILE_T timesteps per grid step.
# ---------------------------------------------------------------------------
def _lstm_recurrence_kernel(maxlen_ref, gin_ref, lens_ref, whh_ref,
                            o_ref, h_scr, c_scr):
    tile_t = gin_ref.shape[0]
    h_dim = o_ref.shape[2]                                   # lane-aligned (128 multiple)
    t0 = pl.program_id(0) * tile_t

    @pl.when(pl.program_id(0) == 0)
    def _():
        h_scr[...] = jnp.zeros_like(h_scr)
        c_scr[...] = jnp.zeros_like(c_scr)

    maxlen = maxlen_ref[0]                                   # SMEM scalar (scalar prefetch)

    @pl.when(t0 >= maxlen)
    def _():
        # Whole tile is past every sequence's length: emit zeros, skip all compute
        # (the gin index_map also reuses the previous block, so no dead DMA either).
        o_ref[...] = jnp.zeros_like(o_ref)

    @pl.when(t0 < maxlen)
    def _():
        lens = lens_ref[...]                                 # (N_pad, 1) int32, resident
        whh = whh_ref[...]                                   # (Hp, 4Hp), resident

        def sigmoid(z):
            # One EUP tanh per gate instead of exp + divide.
            return 0.5 * jnp.tanh(0.5 * z) + 0.5

        def step(s, carry):
            h, c = carry                                     # f32, vreg-resident
            t = t0 + s
            # Single fused recurrent matmul per step: (N_pad, Hp) @ (Hp, 4Hp).
            z = (gin_ref[s].astype(jnp.float32)
                 + jnp.dot(h.astype(whh.dtype), whh, preferred_element_type=jnp.float32))
            i_g = sigmoid(z[:, 0 * h_dim:1 * h_dim])
            f_g = sigmoid(z[:, 1 * h_dim:2 * h_dim])
            g_g = jnp.tanh(z[:, 2 * h_dim:3 * h_dim])
            o_g = sigmoid(z[:, 3 * h_dim:4 * h_dim])
            c_new = f_g * c + i_g * g_g
            h_new = o_g * jnp.tanh(c_new)
            # Packed-sequence semantics: freeze state / zero output past each length.
            valid = t < lens                                 # (N_pad, 1) bool
            c = jnp.where(valid, c_new, c)
            h = jnp.where(valid, h_new, h)
            o_ref[s] = jnp.where(valid, h_new, 0.0).astype(o_ref.dtype)
            return (h, c)

        h_fin, c_fin = jax.lax.fori_loop(
            0, tile_t, step, (h_scr[...], c_scr[...]), unroll=True)
        # Write state back to scratch once per time block (not per step).
        h_scr[...] = h_fin
        c_scr[...] = c_fin


# ---------------------------------------------------------------------------
# Wrapper
# ---------------------------------------------------------------------------
def batch_rnn_forward(x, lengths, bn_scale, bn_shift, w_ih, w_hh, b_ih, b_hh,
                      *, tile_t=16, tile_rows=512, matmul_dtype=jnp.bfloat16):
    """BatchRNN forward.

    x:        (T, N, D) float32, time-major (torch LSTM convention).
    lengths:  (N,) int32 valid lengths (pack_padded_sequence's output_lengths).
    bn_scale: (D,) = gamma / sqrt(running_var + eps)      (eval-mode BN)
    bn_shift: (D,) = beta - running_mean * bn_scale
    w_ih:     (4H, D), w_hh: (4H, H), b_ih/b_hh: (4H,) — PyTorch layout, gate order i,f,g,o.
    Returns   (T, N, H) float32, zeroed past each sequence's length.
    """
    T, N, D = x.shape
    H = w_hh.shape[1]
    hp = jax.lax.Precision.HIGHEST
    vmem_limit = _vmem_limit_bytes()

    # --- Pad hidden size to a 128-lane multiple (lane-aligned gate slices / dense stores).
    H_pad = ((H + 127) // 128) * 128
    H4 = 4 * H_pad
    w_ih_g = w_ih.reshape(4, H, D)
    w_hh_g = w_hh.reshape(4, H, H)
    b_g = (b_ih + b_hh).reshape(4, H)
    if H_pad != H:
        # Zero padding keeps padded gate/state columns exactly zero through the recurrence.
        w_ih_g = jnp.pad(w_ih_g, ((0, 0), (0, H_pad - H), (0, 0)))
        w_hh_g = jnp.pad(w_hh_g, ((0, 0), (0, H_pad - H), (0, H_pad - H)))
        b_g = jnp.pad(b_g, ((0, 0), (0, H_pad - H)))

    # Fused, transposed layouts: columns ordered [i|f|g|o] blocks of width H_pad.
    w_in = w_ih_g.transpose(2, 0, 1).reshape(D, H4)                  # (D, 4Hp)
    w_rec = w_hh_g.transpose(2, 0, 1).reshape(H_pad, H4)             # (Hp, 4Hp)
    bias = b_g.reshape(1, H4)

    # Fold eval-mode BN into the input projection (gate order preserved).
    w_in_folded = bn_scale[:, None] * w_in                           # diag(scale) @ W_in
    b_folded = bias + jnp.dot(bn_shift.reshape(1, D), w_in, precision=hp)

    # --- Pad batch (16 sublanes for bf16 packing, else 8) and time to tile multiples.
    sub = 16 if matmul_dtype == jnp.bfloat16 else 8
    n_pad = ((N + sub - 1) // sub) * sub
    tile_t = max(1, min(tile_t, T))
    t_pad = pl.cdiv(T, tile_t) * tile_t
    lengths = lengths.astype(jnp.int32)
    if n_pad != N:
        x = jnp.pad(x, ((0, 0), (0, n_pad - N), (0, 0)))
        lengths = jnp.pad(lengths, (0, n_pad - N))           # padded rows: length 0 -> zeros
    if t_pad != T:
        x = jnp.pad(x, ((0, t_pad - T), (0, 0), (0, 0)))

    # --- Phase 1: one big GEMM over all (T*N) rows, off the serial chain.
    # Pre-cast x and store G in matmul_dtype (halves the dominant HBM stream at bf16).
    gin = _input_projection(x.reshape(t_pad * n_pad, D).astype(matmul_dtype),
                            w_in_folded.astype(matmul_dtype), b_folded,
                            tile_rows=tile_rows, out_dtype=matmul_dtype,
                            vmem_limit=vmem_limit)
    gin = gin.reshape(t_pad, n_pad, H4)

    # --- Phase 2: serial recurrence.
    maxlen = jnp.max(lengths).reshape(1).astype(jnp.int32)
    lens_v = lengths.reshape(n_pad, 1)

    def gin_index_map(t, ml):
        # Reuse the last useful block for fully-padded time tiles (suppresses dead DMAs).
        last_blk = jnp.maximum(ml[0] - 1, 0) // tile_t
        return (jnp.minimum(t, last_blk), 0, 0)

    out = pl.pallas_call(
        _lstm_recurrence_kernel,
        out_shape=jax.ShapeDtypeStruct((t_pad, n_pad, H_pad), jnp.float32),
        grid_spec=pltpu.PrefetchScalarGridSpec(
            num_scalar_prefetch=1,
            grid=(t_pad // tile_t,),
            in_specs=[
                pl.BlockSpec((tile_t, n_pad, H4), gin_index_map),            # G tiles
                pl.BlockSpec((n_pad, 1), lambda t, ml: (0, 0),               # lengths
                             pipeline_mode=pl.Buffered(1)),
                pl.BlockSpec((H_pad, H4), lambda t, ml: (0, 0),              # W_hh (fused)
                             pipeline_mode=pl.Buffered(1)),
            ],
            out_specs=pl.BlockSpec((tile_t, n_pad, H_pad), lambda t, ml: (t, 0, 0)),
            scratch_shapes=[pltpu.VMEM((n_pad, H_pad), jnp.float32),         # h
                            pltpu.VMEM((n_pad, H_pad), jnp.float32)],        # c
        ),
        compiler_params=pltpu.CompilerParams(
            dimension_semantics=("arbitrary",),              # serial time dependence
            vmem_limit_bytes=vmem_limit),
    )(maxlen, gin, lens_v, w_rec.astype(matmul_dtype))

    return out[:T, :N, :H]


# ---------------------------------------------------------------------------
# Pure-JAX reference (explicit BN, per-gate weights, HIGHEST precision).
# ---------------------------------------------------------------------------
def reference_forward(x, lengths, bn_scale, bn_shift, w_ih, w_hh, b_ih, b_hh):
    T, N, D = x.shape
    H = w_hh.shape[1]
    hp = jax.lax.Precision.HIGHEST
    xb = x * bn_scale[None, None, :] + bn_shift[None, None, :]
    w_ih_g = w_ih.reshape(4, H, D)
    w_hh_g = w_hh.reshape(4, H, H)
    b_g = (b_ih + b_hh).reshape(4, H)

    def step(carry, inp):
        h, c = carry
        xt, t = inp
        z = [jnp.dot(xt, w_ih_g[k].T, precision=hp)
             + jnp.dot(h, w_hh_g[k].T, precision=hp) + b_g[k] for k in range(4)]
        i = jax.nn.sigmoid(z[0])
        f = jax.nn.sigmoid(z[1])
        g = jnp.tanh(z[2])
        o = jax.nn.sigmoid(z[3])
        c_new = f * c + i * g
        h_new = o * jnp.tanh(c_new)
        mask = (t < lengths)[:, None]
        c = jnp.where(mask, c_new, c)
        h = jnp.where(mask, h_new, h)
        out = jnp.where(mask, h_new, 0.0)
        return (h, c), out

    init = (jnp.zeros((N, H), jnp.float32), jnp.zeros((N, H), jnp.float32))
    _, outs = jax.lax.scan(step, init, (xb, jnp.arange(T, dtype=jnp.int32)))
    return outs


if __name__ == "__main__":
    # Small shapes consistent with BatchRNN(input_size=32, hidden_size=32).
    T, N, D, H = 8, 4, 32, 32

    key = jax.random.PRNGKey(0)
    ks = jax.random.split(key, 9)

    x = jax.random.normal(ks[0], (T, N, D), dtype=jnp.float32)
    # pack_padded_sequence expects sorted-descending lengths; max == T.
    lengths = jnp.array([T, 6, 5, 3], dtype=jnp.int32)

    # SequenceWise(BatchNorm1d(D)) parameters (eval mode -> affine scale/shift).
    bn_weight = 1.0 + 0.1 * jax.random.normal(ks[1], (D,), dtype=jnp.float32)
    bn_bias = 0.1 * jax.random.normal(ks[2], (D,), dtype=jnp.float32)
    running_mean = 0.2 * jax.random.normal(ks[3], (D,), dtype=jnp.float32)
    running_var = 1.0 + 0.1 * jax.random.uniform(ks[4], (D,), dtype=jnp.float32)
    eps = 1e-5
    inv_std = 1.0 / jnp.sqrt(running_var + eps)
    bn_scale = bn_weight * inv_std
    bn_shift = bn_bias - running_mean * bn_weight * inv_std

    # LSTM parameters (PyTorch layout: (4H, D)/(4H, H), gate order i, f, g, o).
    stdv = 1.0 / (H ** 0.5)
    w_ih = jax.random.uniform(ks[5], (4 * H, D), minval=-stdv, maxval=stdv, dtype=jnp.float32)
    w_hh = jax.random.uniform(ks[6], (4 * H, H), minval=-stdv, maxval=stdv, dtype=jnp.float32)
    b_ih = jax.random.uniform(ks[7], (4 * H,), minval=-stdv, maxval=stdv, dtype=jnp.float32)
    b_hh = jax.random.uniform(ks[8], (4 * H,), minval=-stdv, maxval=stdv, dtype=jnp.float32)

    ref = reference_forward(x, lengths, bn_scale, bn_shift, w_ih, w_hh, b_ih, b_hh)

    # f32-weight path (tolerance leaves room for TPU default-precision matmuls).
    out = batch_rnn_forward(x, lengths, bn_scale, bn_shift, w_ih, w_hh, b_ih, b_hh,
                            tile_t=8, matmul_dtype=jnp.float32)
    out = jax.block_until_ready(out)
    assert out.shape == (T, N, H)
    assert jnp.allclose(out, ref, atol=2e-2, rtol=2e-2), "f32 kernel mismatch vs reference"

    # bf16 path (default: MXU-native weights + bf16 gin stream, f32 accumulate/state).
    out_bf16 = batch_rnn_forward(x, lengths, bn_scale, bn_shift, w_ih, w_hh, b_ih, b_hh,
                                 tile_t=16, matmul_dtype=jnp.bfloat16)
    out_bf16 = jax.block_until_ready(out_bf16)
    assert out_bf16.shape == (T, N, H)
    assert jnp.allclose(out_bf16, ref, atol=5e-2, rtol=5e-2), "bf16 kernel mismatch vs reference"

    print("KERNEL_OK")
</pallas_src>

<mosaic_0001>
module attributes {stable_mosaic.version = 11 : i64} {
  func.func @_input_proj_kernel(%arg0: i32, %arg1: memref<64x32xf32, #tpu.memory_space<vmem>>, %arg2: memref<32x512xf32, #tpu.memory_space<vmem>>, %arg3: memref<1x512xf32, #tpu.memory_space<vmem>>, %arg4: memref<64x512xf32, #tpu.memory_space<vmem>>) attributes {dimension_semantics = [#tpu.dimension_semantics<parallel>], iteration_bounds = array<i64: 1>, scalar_prefetch = 0 : i64, scratch_operands = 0 : i64, tpu.core_type = #tpu.core_type<tc>, window_params = [{transform_indices = @transform_0, window_bounds = array<i64: 64, 32>}, {pipeline_mode = #tpu.pipeline_mode<synchronous>, transform_indices = @transform_1, window_bounds = array<i64: 32, 512>}, {pipeline_mode = #tpu.pipeline_mode<synchronous>, transform_indices = @transform_2, window_bounds = array<i64: 1, 512>}, {transform_indices = @transform_3, window_bounds = array<i64: 64, 512>}]} {
    %c0 = arith.constant 0 : index
    %c0_0 = arith.constant 0 : index
    %0 = vector.load %arg1[%c0, %c0_0] : memref<64x32xf32, #tpu.memory_space<vmem>>, vector<64x32xf32>
    %c0_1 = arith.constant 0 : index
    %c0_2 = arith.constant 0 : index
    %1 = vector.load %arg2[%c0_1, %c0_2] : memref<32x512xf32, #tpu.memory_space<vmem>>, vector<32x512xf32>
    %cst = arith.constant dense<0.000000e+00> : vector<64x512xf32>
    %2 = tpu.matmul %0, %1, %cst {dimension_numbers = #tpu.dot_dimension_numbers<[1], [0], [0], [1], [0, 0, 1, 1], [], []>} : vector<64x32xf32>, vector<32x512xf32>, vector<64x512xf32> -> vector<64x512xf32>
    %c0_3 = arith.constant 0 : index
    %c0_4 = arith.constant 0 : index
    %3 = vector.load %arg3[%c0_3, %c0_4] : memref<1x512xf32, #tpu.memory_space<vmem>>, vector<1x512xf32>
    %4 = vector.broadcast %3 : vector<1x512xf32> to vector<64x512xf32>
    %5 = arith.addf %2, %4 : vector<64x512xf32>
    %c0_5 = arith.constant 0 : index
    %c0_6 = arith.constant 0 : index
    %6 = vector.load %arg4[%c0_5, %c0_6] : memref<64x512xf32, #tpu.memory_space<vmem>>, vector<64x512xf32>
    tpu.vector_store %arg4[%c0_5, %c0_6], %5 {strides = array<i32>} : memref<64x512xf32, #tpu.memory_space<vmem>>, vector<64x512xf32>,
    return
  }
  func.func @transform_0(%arg0: i32) -> (i32, i32) {
    %c0_i32 = arith.constant 0 : i32
    %c0_i32_0 = arith.constant 0 : i32
    return %arg0, %c0_i32 : i32, i32
  }
  func.func @transform_1(%arg0: i32) -> (i32, i32) {
    %c0_i32 = arith.constant 0 : i32
    %c0_i32_0 = arith.constant 0 : i32
    %c0_i32_1 = arith.constant 0 : i32
    return %c0_i32, %c0_i32_0 : i32, i32
  }
  func.func @transform_2(%arg0: i32) -> (i32, i32) {
    %c0_i32 = arith.constant 0 : i32
    %c0_i32_0 = arith.constant 0 : i32
    %c0_i32_1 = arith.constant 0 : i32
    return %c0_i32, %c0_i32_0 : i32, i32
  }
  func.func @transform_3(%arg0: i32) -> (i32, i32) {
    %c0_i32 = arith.constant 0 : i32
    %c0_i32_0 = arith.constant 0 : i32
    return %arg0, %c0_i32 : i32, i32
  }
}

</mosaic_0001>

<bundles_post_ra>
// kernel: tpu_custom_call.1
= control target key start
LH: loop header
LB: loop body
LE: loop exit
PB: predicated region body
PF: predicated region fallthrough
CT: control target
= control target key end

     0   :  { %8 = vsyncpa [#allocation3], 0  ;;  %s528_s0 = inlined_call_operand.vmem [shape: f32[64,32], index: 0, kind: input, shape index: {}]   ;;  %s529_s1 = inlined_call_operand.hbm [shape: f32[32,512], index: 1, kind: input, shape index: {}]   ;;  %s530_s2 = inlined_call_operand.vmem [shape: f32[1,512], index: 2, kind: input, shape index: {}]   ;;  %s531_s3 = inlined_call_operand.hbm [shape: f32[64,512], index: 3, kind: output, shape index: {}]  }
   0x1   :  { %9 = vsyncpa [#allocation4], 0  ;;  %s16_s14 = sshll.u32 %s529_s1, 4  ;;  %s393_s15 = smov [#allocation2]   ;;  %s17_s14 = int_to_ptr.hbm [resolvable:$true] %s16_s14 }
   0x2   :  { %s18_s16 = sshll.u32 %s393_s15, 4  ;;  %s394_s17 = smov 512   ;;  %s19_s16 = int_to_ptr.vmem [resolvable:$true] %s18_s16 }
   0x3   :  { %s395_s18 = smov 32  }
   0x4   :  { %24 = dma.hbm_to_vmem [thread:$0]  %s17_s14, 2048, %s19_s16, [#allocation3], %s394_s17, %s394_s17, %s395_s18  }
   0x5   :  { %389 = dma.done.wait [#allocation3], 2048  }
   0x6   :  { %390 = vsyncadd [#allocation3], 4294965248  ;;  %v53_v0 = vld [vmem:[#allocation2 + $0x70] sm:$0xff]  ;;  %v54_v1 = vld [vmem:[#allocation2 + $0x78] sm:$0xff]  ;;  %vm65_vm0 = vcmask 261120   ;;  %s292_s11 = sshll.u32 %s531_s3, 4  ;;  %s293_s11 = int_to_ptr.hbm [resolvable:$true] %s292_s11 }
   0x7   :  { %v49_v2 = vld [vmem:[#allocation2 + $0x50] sm:$0xff]  ;;  %184 = vmatpush.msra.mxu2 %v53_v0  ;;  %225 = vmatpush.msra.mxu3 %v54_v1  ;;  %v50_v3 = vld [vmem:[#allocation2 + $0x58] sm:$0xff]  ;;  %v51_v6 = vld [vmem:[#allocation2 + $0x60] sm:$0xff] }
   0x8   :  { %v45_v4 = vld [vmem:[#allocation2 + $0x30] sm:$0xff]  ;;  %v46_v5 = vld [vmem:[#allocation2 + $0x38] sm:$0xff]  ;;  %v52_v7 = vld [vmem:[#allocation2 + $0x68] sm:$0xff]  ;;  %102 = vmatpush.msra.mxu0 %v51_v6 }
   0x9   :  { %185 = vmatpush.msra.mxu2 %v49_v2  ;;  %226 = vmatpush.msra.mxu3 %v50_v3  ;;  %v47_v8 = vld [vmem:[#allocation2 + $0x40] sm:$0xff]  ;;  %v41_v9 = vld [vmem:[#allocation2 + $0x10] sm:$0xff]  ;;  %v42_v10 = vld [vmem:[#allocation2 + $0x18] sm:$0xff] }
   0xa   :  { %143 = vmatpush.msra.mxu1 %v52_v7  ;;  %v48_v11 = vld [vmem:[#allocation2 + $0x48] sm:$0xff]  ;;  %v31_v12 = vld [vmem:[%s528_s0] sm:$0xff]  ;;  %103 = vmatpush.msra.mxu0 %v47_v8  ;;  %v33_v18 = vld [vmem:[%s528_s0 + $0x10] sm:$0xff] }
   0xb   :  { %186 = vmatpush.msra.mxu2 %v45_v4  ;;  %227 = vmatpush.msra.mxu3 %v46_v5  ;;  %v43_v13 = vld [vmem:[#allocation2 + $0x20] sm:$0xff]  ;;  %v44_v14 = vld [vmem:[#allocation2 + $0x28] sm:$0xff]  ;;  %v34_v19 = vld [vmem:[%s528_s0 + $0x18] sm:$0xff] }
   0xc   :  { %144 = vmatpush.msra.mxu1 %v48_v11  ;;  %v39_v15 = vld [vmem:[#allocation2] sm:$0xff]  ;;  %v40_v16 = vld [vmem:[#allocation2 + $0x8] sm:$0xff]  ;;  %104 = vmatpush.msra.mxu0 %v43_v13  ;;  %v37_v22 = vld [vmem:[%s528_s0 + $0x30] sm:$0xff] }
   0xd   :  { %187 = vmatpush.msra.mxu2 %v41_v9  ;;  %228 = vmatpush.msra.mxu3 %v42_v10  ;;  %v32_v17 = vld [vmem:[%s528_s0 + $0x8] sm:$0xff]  ;;  %v35_v20 = vld [vmem:[%s528_s0 + $0x20] sm:$0xff]  ;;  %v38_v23 = vld [vmem:[%s528_s0 + $0x38] sm:$0xff] }
   0xe   :  { %321 = vmatmul.msk.f32.vlgmr.msra.gmra.mxu2 %vm65_vm0, %v31_v12  ;;  %329 = vmatmul.msk.f32.vlgmr.msra.gmra.mxu3 %vm65_vm0, %v31_v12  ;;  %v36_v21 = vld [vmem:[%s528_s0 + $0x28] sm:$0xff]  ;;  %v55_v24 = vld [vmem:[%s530_s2] sm:$0xf]  ;;  %s396_s0 = smov [#allocation5]  }
   0xf   :  { %145 = vmatpush.msra.mxu1 %v44_v14  ;;  %105 = vmatpush.msra.mxu0 %v39_v15  ;;  %v482_v25 = vperm.slane %v55_v24, 0  ;;  %v484_v26 = vperm.slane %v55_v24, 1  ;;  %v486_v27 = vperm.slane %v55_v24, 2  ;;  %v488_v28 = vperm.slane %v55_v24, 3  ;;  %s290_s2 = sshll.u32 %s396_s0, 4  ;;  %s291_s2 = int_to_ptr.vmem [resolvable:$true] %s290_s2 }
  0x10   :  { %305 = vmatmul.msk.f32.vlgmr.msra.gmra.mxu0 %vm65_vm0, %v31_v12 }
  0x11   :  { %146 = vmatpush.msra.mxu1 %v40_v16 }
  0x12   :  { %313 = vmatmul.msk.f32.vlgmr.msra.gmra.mxu1 %vm65_vm0, %v31_v12 }
  0x16   :  { %322 = vmatmul.msk.f32.gmra.mxu2 %vm65_vm0, %v32_v17  ;;  %330 = vmatmul.msk.f32.gmra.mxu3 %vm65_vm0, %v32_v17 }
  0x18   :  { %306 = vmatmul.msk.f32.gmra.mxu0 %vm65_vm0, %v32_v17 }
  0x1a   :  { %314 = vmatmul.msk.f32.gmra.mxu1 %vm65_vm0, %v32_v17 }
  0x1e   :  { %323 = vmatmul.msk.f32.gmra.mxu2 %vm65_vm0, %v33_v18  ;;  %331 = vmatmul.msk.f32.gmra.mxu3 %vm65_vm0, %v33_v18 }
  0x20   :  { %307 = vmatmul.msk.f32.gmra.mxu0 %vm65_vm0, %v33_v18 }
  0x22   :  { %315 = vmatmul.msk.f32.gmra.mxu1 %vm65_vm0, %v33_v18 }
  0x26   :  { %324 = vmatmul.msk.f32.gmra.mxu2 %vm65_vm0, %v34_v19  ;;  %332 = vmatmul.msk.f32.gmra.mxu3 %vm65_vm0, %v34_v19 }
  0x28   :  { %308 = vmatmul.msk.f32.gmra.mxu0 %vm65_vm0, %v34_v19 }
  0x2a   :  { %316 = vmatmul.msk.f32.gmra.mxu1 %vm65_vm0, %v34_v19 }
  0x2e   :  { %325 = vmatmul.msk.f32.gmra.mxu2 %vm65_vm0, %v35_v20  ;;  %333 = vmatmul.msk.f32.gmra.mxu3 %vm65_vm0, %v35_v20 }
  0x30   :  { %309 = vmatmul.msk.f32.gmra.mxu0 %vm65_vm0, %v35_v20 }
  0x32   :  { %317 = vmatmul.msk.f32.gmra.mxu1 %vm65_vm0, %v35_v20 }
  0x36   :  { %326 = vmatmul.msk.f32.gmra.mxu2 %vm65_vm0, %v36_v21  ;;  %334 = vmatmul.msk.f32.gmra.mxu3 %vm65_vm0, %v36_v21 }
  0x38   :  { %310 = vmatmul.msk.f32.gmra.mxu0 %vm65_vm0, %v36_v21 }
  0x3a   :  { %318 = vmatmul.msk.f32.gmra.mxu1 %vm65_vm0, %v36_v21 }
  0x3e   :  { %327 = vmatmul.msk.f32.gmra.mxu2 %vm65_vm0, %v37_v22  ;;  %335 = vmatmul.msk.f32.gmra.mxu3 %vm65_vm0, %v37_v22 }
  0x40   :  { %311 = vmatmul.msk.f32.gmra.mxu0 %vm65_vm0, %v37_v22 }
  0x42   :  { %319 = vmatmul.msk.f32.gmra.mxu1 %vm65_vm0, %v37_v22 }
  0x46   :  { %328 = vmatmul.msk.f32.gmra.mxu2 %vm65_vm0, %v38_v23  ;;  %336 = vmatmul.msk.f32.gmra.mxu3 %vm65_vm0, %v38_v23 }
  0x48   :  { %312 = vmatmul.msk.f32.gmra.mxu0 %vm65_vm0, %v38_v23 }
  0x4a   :  { %320 = vmatmul.msk.f32.gmra.mxu1 %vm65_vm0, %v38_v23 }
  0x8d   :  { %v107_v29 = vpop.f32.mrf.mxu0 }
  0x8e   :  { %v108_v31 = vadd.f32 %v107_v29, %v482_v25 }
  0x8f   :  { %v148_v30 = vpop.f32.mrf.mxu1 }
  0x90   :  { %v149_v32 = vadd.f32 %v148_v30, %v484_v26  ;;  %254 = vst [vmem:[#allocation5] sm:$0xff] %v108_v31 }
  0x91   :  { %v189_v33 = vpop.f32.mrf.mxu2  ;;  %v230_v34 = vpop.f32.mrf.mxu3 }
  0x92   :  { %v190_v35 = vadd.f32 %v189_v33, %v486_v27  ;;  %v231_v36 = vadd.f32 %v230_v34, %v488_v28  ;;  %255 = vst [vmem:[#allocation5 + $0x8] sm:$0xff] %v149_v32 }
  0x94   :  { %256 = vst [vmem:[#allocation5 + $0x10] sm:$0xff] %v190_v35 }
  0x95   :  { %257 = vst [vmem:[#allocation5 + $0x18] sm:$0xff] %v231_v36  ;;  %v110_v37 = vpop.f32.mrf.mxu0 }
  0x96   :  { %v111_v39 = vadd.f32 %v110_v37, %v482_v25 }
  0x97   :  { %v151_v38 = vpop.f32.mrf.mxu1 }
  0x98   :  { %v152_v40 = vadd.f32 %v151_v38, %v484_v26  ;;  %258 = vst [vmem:[#allocation5 + $0x20] sm:$0xff] %v111_v39 }
  0x99   :  { %v192_v41 = vpop.f32.mrf.mxu2  ;;  %v233_v42 = vpop.f32.mrf.mxu3 }
  0x9a   :  { %v193_v43 = vadd.f32 %v192_v41, %v486_v27  ;;  %v234_v44 = vadd.f32 %v233_v42, %v488_v28  ;;  %259 = vst [vmem:[#allocation5 + $0x28] sm:$0xff] %v152_v40 }
  0x9c   :  { %260 = vst [vmem:[#allocation5 + $0x30] sm:$0xff] %v193_v43 }
  0x9d   :  { %261 = vst [vmem:[#allocation5 + $0x38] sm:$0xff] %v234_v44  ;;  %v113_v45 = vpop.f32.mrf.mxu0 }
  0x9e   :  { %v114_v47 = vadd.f32 %v113_v45, %v482_v25 }
  0x9f   :  { %v154_v46 = vpop.f32.mrf.mxu1 }
  0xa0   :  { %v155_v48 = vadd.f32 %v154_v46, %v484_v26  ;;  %262 = vst [vmem:[#allocation5 + $0x40] sm:$0xff] %v114_v47 }
  0xa1   :  { %v195_v49 = vpop.f32.mrf.mxu2  ;;  %v236_v50 = vpop.f32.mrf.mxu3 }
  0xa2   :  { %v196_v51 = vadd.f32 %v195_v49, %v486_v27  ;;  %v237_v52 = vadd.f32 %v236_v50, %v488_v28  ;;  %263 = vst [vmem:[#allocation5 + $0x48] sm:$0xff] %v155_v48 }
  0xa4   :  { %264 = vst [vmem:[#allocation5 + $0x50] sm:$0xff] %v196_v51 }
  0xa5   :  { %265 = vst [vmem:[#allocation5 + $0x58] sm:$0xff] %v237_v52  ;;  %v116_v53 = vpop.f32.mrf.mxu0 }
  0xa6   :  { %v117_v55 = vadd.f32 %v116_v53, %v482_v25 }
  0xa7   :  { %v157_v54 = vpop.f32.mrf.mxu1 }
  0xa8   :  { %v158_v56 = vadd.f32 %v157_v54, %v484_v26  ;;  %266 = vst [vmem:[#allocation5 + $0x60] sm:$0xff] %v117_v55 }
  0xa9   :  { %v198_v57 = vpop.f32.mrf.mxu2  ;;  %v239_v58 = vpop.f32.mrf.mxu3 }
  0xaa   :  { %v199_v59 = vadd.f32 %v198_v57, %v486_v27  ;;  %v240_v60 = vadd.f32 %v239_v58, %v488_v28  ;;  %267 = vst [vmem:[#allocation5 + $0x68] sm:$0xff] %v158_v56 }
  0xac   :  { %268 = vst [vmem:[#allocation5 + $0x70] sm:$0xff] %v199_v59 }
  0xad   :  { %269 = vst [vmem:[#allocation5 + $0x78] sm:$0xff] %v240_v60  ;;  %v119_v61 = vpop.f32.mrf.mxu0 }
  0xae   :  { %v120_v63 = vadd.f32 %v119_v61, %v482_v25 }
  0xaf   :  { %v160_v62 = vpop.f32.mrf.mxu1 }
  0xb0   :  { %v161_v0 = vadd.f32 %v160_v62, %v484_v26  ;;  %270 = vst [vmem:[#allocation5 + $0x80] sm:$0xff] %v120_v63 }
  0xb1   :  { %v201_v1 = vpop.f32.mrf.mxu2  ;;  %v242_v2 = vpop.f32.mrf.mxu3 }
  0xb2   :  { %v202_v3 = vadd.f32 %v201_v1, %v486_v27  ;;  %v243_v4 = vadd.f32 %v242_v2, %v488_v28  ;;  %271 = vst [vmem:[#allocation5 + $0x88] sm:$0xff] %v161_v0 }
  0xb4   :  { %272 = vst [vmem:[#allocation5 + $0x90] sm:$0xff] %v202_v3 }
  0xb5   :  { %273 = vst [vmem:[#allocation5 + $0x98] sm:$0xff] %v243_v4  ;;  %v122_v5 = vpop.f32.mrf.mxu0 }
  0xb6   :  { %v123_v7 = vadd.f32 %v122_v5, %v482_v25 }
  0xb7   :  { %v163_v6 = vpop.f32.mrf.mxu1 }
  0xb8   :  { %v164_v8 = vadd.f32 %v163_v6, %v484_v26  ;;  %274 = vst [vmem:[#allocation5 + $0xa0] sm:$0xff] %v123_v7 }
  0xb9   :  { %v204_v9 = vpop.f32.mrf.mxu2  ;;  %v245_v10 = vpop.f32.mrf.mxu3 }
  0xba   :  { %v205_v11 = vadd.f32 %v204_v9, %v486_v27  ;;  %v246_v12 = vadd.f32 %v245_v10, %v488_v28  ;;  %275 = vst [vmem:[#allocation5 + $0xa8] sm:$0xff] %v164_v8 }
  0xbc   :  { %276 = vst [vmem:[#allocation5 + $0xb0] sm:$0xff] %v205_v11 }
  0xbd   :  { %277 = vst [vmem:[#allocation5 + $0xb8] sm:$0xff] %v246_v12  ;;  %v125_v13 = vpop.f32.mrf.mxu0 }
  0xbe   :  { %v126_v15 = vadd.f32 %v125_v13, %v482_v25 }
  0xbf   :  { %v166_v14 = vpop.f32.mrf.mxu1 }
  0xc0   :  { %v167_v16 = vadd.f32 %v166_v14, %v484_v26  ;;  %278 = vst [vmem:[#allocation5 + $0xc0] sm:$0xff] %v126_v15 }
  0xc1   :  { %v207_v17 = vpop.f32.mrf.mxu2  ;;  %v248_v18 = vpop.f32.mrf.mxu3 }
  0xc2   :  { %v208_v19 = vadd.f32 %v207_v17, %v486_v27  ;;  %v249_v20 = vadd.f32 %v248_v18, %v488_v28  ;;  %279 = vst [vmem:[#allocation5 + $0xc8] sm:$0xff] %v167_v16 }
  0xc4   :  { %280 = vst [vmem:[#allocation5 + $0xd0] sm:$0xff] %v208_v19 }
  0xc5   :  { %281 = vst [vmem:[#allocation5 + $0xd8] sm:$0xff] %v249_v20  ;;  %v128_v21 = vpop.f32.mrf.mxu0 }
  0xc6   :  { %v129_v23 = vadd.f32 %v128_v21, %v482_v25 }
  0xc7   :  { %v169_v22 = vpop.f32.mrf.mxu1 }
  0xc8   :  { %v170_v24 = vadd.f32 %v169_v22, %v484_v26  ;;  %282 = vst [vmem:[#allocation5 + $0xe0] sm:$0xff] %v129_v23 }
  0xc9   :  { %v210_v29 = vpop.f32.mrf.mxu2  ;;  %v251_v30 = vpop.f32.mrf.mxu3 }
  0xca   :  { %v211_v31 = vadd.f32 %v210_v29, %v486_v27  ;;  %v252_v32 = vadd.f32 %v251_v30, %v488_v28  ;;  %283 = vst [vmem:[#allocation5 + $0xe8] sm:$0xff] %v170_v24 }
  0xcc   :  { %284 = vst [vmem:[#allocation5 + $0xf0] sm:$0xff] %v211_v31 }
  0xcd   :  { %285 = vst [vmem:[#allocation5 + $0xf8] sm:$0xff] %v252_v32 }
  0xce   :  { %298 = dma.vmem_to_hbm [thread:$0]  %s291_s2, 4096, %s293_s11, [#allocation4], %s394_s17, %s394_s17, %s395_s18  }
  0xcf   :  { %391 = dma.done.wait [#allocation4], 4096  }
  0xd0   :  { %392 = vsyncadd [#allocation4], 4294963200 }
  0xd1   :  { %303 = vsyncpa [#allocation3], 1 }
  0xd2   :  { %304 = vsyncpa [#allocation4], 1 }

</bundles_post_ra>
